<compile_context>
chip_gen: v7x
topology: tpu7x:2x2x1
jax: 0.10.0
libtpu: 0.0.40
codegen_flags: <defaults>
</compile_context>

<pallas_src>
import math
from functools import partial

import jax
import jax.numpy as jnp
from jax import lax
from jax.experimental import pallas as pl
from jax.experimental.pallas import tpu as pltpu  # noqa: F401  (TPU backend)

NEG_SLOPE = 0.01      # F.leaky_relu default negative_slope
MASK_VALUE = -1e30


# ----------------------------- Pallas kernel ------------------------------ #
def _masked_softmax_aggregate(el_row, er_col, mask, z):
    """alpha[v,:] = softmax_u(leaky_relu(el[u] + er[v])) over neighbors; alpha @ z.

    el_row : [1, N]   el[u] = a_src . z_u
    er_col : [N, 1]   er[v] = a_dst . z_v
    mask   : [N, N]   bool, mask[v, u] = edge u -> v
    z      : [N, D]
    """
    s = el_row + er_col                          # [N, N] VPU broadcast add
    s = jnp.where(s > 0, s, NEG_SLOPE * s)       # F.leaky_relu
    s = jnp.where(mask, s, MASK_VALUE)
    m = jnp.max(s, axis=-1, keepdims=True)
    p = jnp.where(mask, jnp.exp(s - m), 0.0)
    denom = jnp.sum(p, axis=-1, keepdims=True)
    denom = jnp.maximum(denom, 1e-30)            # guard zero-in-degree nodes
    alpha = p * pl.reciprocal(denom, approx=True)
    return jnp.dot(alpha, z, preferred_element_type=jnp.float32)


def gat_fused_kernel(h_ref, adj_ref,
                     w1_ref, asrc1_ref, adst1_ref,
                     w2_ref, asrc2_ref, adst2_ref,
                     out_ref, *, num_heads, hidden_dim):
    """Fused 2-layer GAT forward.

    h_ref     : [N, in_dim]
    adj_ref   : [N, N]                 adj[v, u] = 1 iff edge u -> v
    w1_ref    : [in_dim, H*hidden]     per-head W concatenated along columns
    asrc1_ref : [H, H*hidden]          block-row a_src (row h nonzero on head-h cols)
    adst1_ref : [H*hidden, H]          block-diag a_dst
    w2_ref    : [H*hidden, out_dim]
    asrc2_ref : [1, out_dim]
    adst2_ref : [out_dim, 1]
    out_ref   : [N, out_dim]
    """
    h = h_ref[...]
    mask = adj_ref[...] > 0.0

    # ------------------ layer 1: all heads in one MXU pass ----------------- #
    z1 = jnp.dot(h, w1_ref[...], preferred_element_type=jnp.float32)       # [N, H*D1]
    # el1[hd, u] = a_src_hd . z1_u(head hd)  -- row layout, no transpose needed
    el1 = lax.dot_general(asrc1_ref[...], z1, (((1,), (1,)), ((), ())),
                          preferred_element_type=jnp.float32)              # [H, N]
    er1 = jnp.dot(z1, adst1_ref[...], preferred_element_type=jnp.float32)  # [N, H]

    w2 = w2_ref[...]                                                       # [H*D1, D2]
    d2 = w2.shape[1]
    z2 = jnp.zeros((h.shape[0], d2), jnp.float32)
    for hd in range(num_heads):                                            # static unroll
        lo = hd * hidden_dim
        z_h = z1[:, lo:lo + hidden_dim]                                    # [N, D1]
        o_h = _masked_softmax_aggregate(el1[hd:hd + 1, :],
                                        er1[:, hd:hd + 1], mask, z_h)      # [N, D1]
        o_h = jnp.where(o_h > 0, o_h, jnp.exp(o_h) - 1.0)                  # F.elu
        # 'cat' merge + layer-2 fc fused: h1_cat @ W2 == sum_h h1_h @ W2[block_h]
        z2 = z2 + jnp.dot(o_h, w2[lo:lo + hidden_dim, :],
                          preferred_element_type=jnp.float32)

    # --------------------------- layer 2: 1 head --------------------------- #
    el2 = lax.dot_general(asrc2_ref[...], z2, (((1,), (1,)), ((), ())),
                          preferred_element_type=jnp.float32)              # [1, N]
    er2 = jnp.dot(z2, adst2_ref[...], preferred_element_type=jnp.float32)  # [N, 1]
    out = _masked_softmax_aggregate(el2, er2, mask, z2)                    # [N, D2]
    out_ref[...] = out.astype(out_ref.dtype)


# ------------------------------ JAX wrapper -------------------------------- #
def pack_fused_params(params):
    """Pack stacked per-head params into the fused layouts the kernel expects."""
    w1 = params["w1"]                                   # [H, in, D1]
    H, in_dim, D1 = w1.shape
    w1_cat = jnp.transpose(w1, (1, 0, 2)).reshape(in_dim, H * D1)   # [in, H*D1]

    def block_rows(a_stack):                            # [H, D, 1] -> [H, H*D]
        Hh, D, _ = a_stack.shape
        m = jnp.zeros((Hh, Hh * D), jnp.float32)
        for hd in range(Hh):
            m = m.at[hd, hd * D:(hd + 1) * D].set(a_stack[hd, :, 0])
        return m

    asrc1 = block_rows(params["a_src1"])                # [H, H*D1]
    adst1 = block_rows(params["a_dst1"]).T              # [H*D1, H]

    w2 = params["w2"][0]                                # [H*D1, D2]
    asrc2 = params["a_src2"][0].T                       # [1, D2]
    adst2 = params["a_dst2"][0]                         # [D2, 1]
    return w1_cat, asrc1, adst1, w2, asrc2, adst2


@jax.jit
def gat_forward(h, params, adj):
    """GAT.forward: layer1 (multi-head, cat) -> ELU -> layer2 (1 head), fused."""
    N, _ = h.shape
    num_heads, _, hidden_dim = params["w1"].shape
    out_dim = params["w2"].shape[-1]
    w1_cat, asrc1, adst1, w2, asrc2, adst2 = pack_fused_params(params)

    kernel = partial(gat_fused_kernel, num_heads=num_heads,
                     hidden_dim=hidden_dim)
    return pl.pallas_call(
        kernel,
        out_shape=jax.ShapeDtypeStruct((N, out_dim), jnp.float32),
    )(h, adj, w1_cat, asrc1, adst1, w2, asrc2, adst2)


# --------------------------- Parameter creation ---------------------------- #
def xavier_normal(key, shape, fan_in, fan_out, gain):
    std = gain * math.sqrt(2.0 / (fan_in + fan_out))
    return std * jax.random.normal(key, shape, dtype=jnp.float32)


def init_gat_params(key, in_dim, hidden_dim, out_dim, num_heads):
    gain = math.sqrt(2.0)  # nn.init.calculate_gain('relu')
    keys = jax.random.split(key, 4 * num_heads + 4)
    ki = iter(range(len(keys)))

    # Layer 1: num_heads heads, in_dim -> hidden_dim
    w1, a_src1, a_dst1 = [], [], []
    for _ in range(num_heads):
        # torch fc.weight: [hidden, in]; we store its transpose [in, hidden]
        w = xavier_normal(keys[next(ki)], (hidden_dim, in_dim),
                          fan_in=in_dim, fan_out=hidden_dim, gain=gain).T
        # torch attn_fc.weight: [1, 2*hidden]
        a = xavier_normal(keys[next(ki)], (1, 2 * hidden_dim),
                          fan_in=2 * hidden_dim, fan_out=1, gain=gain)[0]
        w1.append(w)
        a_src1.append(a[:hidden_dim].reshape(hidden_dim, 1))
        a_dst1.append(a[hidden_dim:].reshape(hidden_dim, 1))

    # Layer 2: 1 head, hidden_dim*num_heads -> out_dim
    in2 = hidden_dim * num_heads
    w2 = xavier_normal(keys[next(ki)], (out_dim, in2),
                       fan_in=in2, fan_out=out_dim, gain=gain).T
    a2 = xavier_normal(keys[next(ki)], (1, 2 * out_dim),
                       fan_in=2 * out_dim, fan_out=1, gain=gain)[0]

    return {
        "w1": jnp.stack(w1),                    # [H, in_dim, hidden]
        "a_src1": jnp.stack(a_src1),            # [H, hidden, 1]
        "a_dst1": jnp.stack(a_dst1),            # [H, hidden, 1]
        "w2": w2[None],                         # [1, hidden*H, out_dim]
        "a_src2": a2[:out_dim].reshape(1, out_dim, 1),
        "a_dst2": a2[out_dim:].reshape(1, out_dim, 1),
    }


def make_adjacency(key, n, p=0.4):
    """Deterministic symmetric random graph (undirected), plus a ring so every
    node has at least one neighbor (mirrors the 'connected' requirement)."""
    upper = jax.random.bernoulli(key, p, (n, n)).astype(jnp.float32)
    upper = jnp.triu(upper, k=1)
    adj = upper + upper.T
    ring = jnp.zeros((n, n), jnp.float32)
    idx = jnp.arange(n)
    ring = ring.at[idx, (idx + 1) % n].set(1.0)
    ring = ring + ring.T
    return jnp.clip(adj + ring, 0.0, 1.0)


# ------------------------------- Reference --------------------------------- #
def gat_layer_ref(h, w_stack, a_src_stack, a_dst_stack, adj):
    outs = []
    for hd in range(w_stack.shape[0]):
        z = h @ w_stack[hd]
        el = (z @ a_src_stack[hd])[:, 0]       # [N]
        er = (z @ a_dst_stack[hd])[:, 0]       # [N]
        s = el[None, :] + er[:, None]          # s[v, u]
        s = jnp.where(s > 0, s, NEG_SLOPE * s)
        s = jnp.where(adj > 0, s, -jnp.inf)
        alpha = jax.nn.softmax(s, axis=-1)
        outs.append(alpha @ z)
    return jnp.concatenate(outs, axis=1)


def gat_forward_ref(h, params, adj):
    h1 = gat_layer_ref(h, params["w1"], params["a_src1"], params["a_dst1"], adj)
    h1 = jax.nn.elu(h1)
    return gat_layer_ref(h1, params["w2"], params["a_src2"], params["a_dst2"], adj)


# ---------------------------------- Main ----------------------------------- #
if __name__ == "__main__":
    N, IN_DIM, HIDDEN_DIM, OUT_DIM, NUM_HEADS = 16, 8, 8, 4, 2

    key = jax.random.PRNGKey(0)
    k_h, k_adj, k_p = jax.random.split(key, 3)

    h = jax.random.normal(k_h, (N, IN_DIM), dtype=jnp.float32)
    adj = make_adjacency(k_adj, N, p=0.4)
    params = init_gat_params(k_p, IN_DIM, HIDDEN_DIM, OUT_DIM, NUM_HEADS)

    out = jax.block_until_ready(gat_forward(h, params, adj))
    assert out.shape == (N, OUT_DIM), out.shape

    ref = jax.block_until_ready(gat_forward_ref(h, params, adj))
    err = float(jnp.max(jnp.abs(out - ref)))
    # Tolerance covers the approx (EUP) reciprocal in the in-kernel softmax and
    # the exp(x)-1 ELU formulation; real bugs produce O(0.1+) errors.
    assert err < 5e-3, err

    print("KERNEL_OK")
</pallas_src>

<mosaic_0001>
module attributes {stable_mosaic.version = 11 : i64} {
  func.func @gat_fused_kernel(%arg0: memref<16x8xf32, #tpu.memory_space<vmem>>, %arg1: memref<16x16xf32, #tpu.memory_space<vmem>>, %arg2: memref<8x16xf32, #tpu.memory_space<vmem>>, %arg3: memref<2x16xf32, #tpu.memory_space<vmem>>, %arg4: memref<16x2xf32, #tpu.memory_space<vmem>>, %arg5: memref<16x4xf32, #tpu.memory_space<vmem>>, %arg6: memref<1x4xf32, #tpu.memory_space<vmem>>, %arg7: memref<4x1xf32, #tpu.memory_space<vmem>>, %arg8: memref<16x4xf32, #tpu.memory_space<vmem>>) attributes {dimension_semantics = [], scalar_prefetch = 0 : i64, scratch_operands = 0 : i64, tpu.core_type = #tpu.core_type<tc>} {
    %c0 = arith.constant 0 : index
    %c0_0 = arith.constant 0 : index
    %0 = vector.load %arg0[%c0, %c0_0] : memref<16x8xf32, #tpu.memory_space<vmem>>, vector<16x8xf32>
    %c0_1 = arith.constant 0 : index
    %c0_2 = arith.constant 0 : index
    %1 = vector.load %arg1[%c0_1, %c0_2] : memref<16x16xf32, #tpu.memory_space<vmem>>, vector<16x16xf32>
    %cst = arith.constant 0.000000e+00 : f32
    %2 = vector.broadcast %cst : f32 to vector<16x16xf32>
    %3 = arith.cmpf ogt, %1, %2 : vector<16x16xf32>
    %c0_3 = arith.constant 0 : index
    %c0_4 = arith.constant 0 : index
    %4 = vector.load %arg2[%c0_3, %c0_4] : memref<8x16xf32, #tpu.memory_space<vmem>>, vector<8x16xf32>
    %cst_5 = arith.constant dense<0.000000e+00> : vector<16x16xf32>
    %5 = tpu.matmul %0, %4, %cst_5 {dimension_numbers = #tpu.dot_dimension_numbers<[1], [0], [0], [1], [0, 0, 1, 1], [], []>} : vector<16x8xf32>, vector<8x16xf32>, vector<16x16xf32> -> vector<16x16xf32>
    %c0_6 = arith.constant 0 : index
    %c0_7 = arith.constant 0 : index
    %6 = vector.load %arg3[%c0_6, %c0_7] : memref<2x16xf32, #tpu.memory_space<vmem>>, vector<2x16xf32>
    %cst_8 = arith.constant dense<0.000000e+00> : vector<2x16xf32>
    %7 = tpu.matmul %6, %5, %cst_8 {dimension_numbers = #tpu.dot_dimension_numbers<[1], [1], [0], [0], [0, 0, 1, 0], [], []>} : vector<2x16xf32>, vector<16x16xf32>, vector<2x16xf32> -> vector<2x16xf32>
    %c0_9 = arith.constant 0 : index
    %c0_10 = arith.constant 0 : index
    %8 = vector.load %arg4[%c0_9, %c0_10] : memref<16x2xf32, #tpu.memory_space<vmem>>, vector<16x2xf32>
    %cst_11 = arith.constant dense<0.000000e+00> : vector<16x2xf32>
    %9 = tpu.matmul %5, %8, %cst_11 {dimension_numbers = #tpu.dot_dimension_numbers<[1], [0], [0], [1], [0, 0, 1, 1], [], []>} : vector<16x16xf32>, vector<16x2xf32>, vector<16x2xf32> -> vector<16x2xf32>
    %c0_12 = arith.constant 0 : index
    %c0_13 = arith.constant 0 : index
    %10 = vector.load %arg5[%c0_12, %c0_13] : memref<16x4xf32, #tpu.memory_space<vmem>>, vector<16x4xf32>
    %cst_14 = arith.constant 0.000000e+00 : f32
    %11 = vector.broadcast %cst_14 : f32 to vector<16x4xf32>
    %12 = vector.extract_strided_slice %5 {offsets = [0, 0], sizes = [16, 8], strides = [1, 1]} : vector<16x16xf32> to vector<16x8xf32>
    %13 = vector.extract_strided_slice %7 {offsets = [0, 0], sizes = [1, 16], strides = [1, 1]} : vector<2x16xf32> to vector<1x16xf32>
    %14 = vector.extract_strided_slice %9 {offsets = [0, 0], sizes = [16, 1], strides = [1, 1]} : vector<16x2xf32> to vector<16x1xf32>
    %15 = vector.broadcast %13 : vector<1x16xf32> to vector<16x16xf32>
    %16 = vector.broadcast %14 : vector<16x1xf32> to vector<16x16xf32>
    %17 = arith.addf %15, %16 : vector<16x16xf32>
    %cst_15 = arith.constant 0.000000e+00 : f32
    %18 = vector.broadcast %cst_15 : f32 to vector<16x16xf32>
    %19 = arith.cmpf ogt, %17, %18 : vector<16x16xf32>
    %cst_16 = arith.constant 0.00999999977 : f32
    %20 = vector.broadcast %cst_16 : f32 to vector<16x16xf32>
    %21 = arith.mulf %20, %17 : vector<16x16xf32>
    %22 = arith.select %19, %17, %21 : vector<16x16xi1>, vector<16x16xf32>
    %cst_17 = arith.constant -1.000000e+30 : f32
    %23 = vector.broadcast %cst_17 : f32 to vector<16x16xf32>
    %24 = arith.select %3, %22, %23 : vector<16x16xi1>, vector<16x16xf32>
    %cst_18 = arith.constant dense<0xFF800000> : vector<16xf32>
    %25 = vector.multi_reduction <maximumf>, %24, %cst_18 [1] : vector<16x16xf32> to vector<16xf32>
    %26 = vector.shape_cast %25 : vector<16xf32> to vector<16x1xf32>
    %27 = vector.broadcast %26 : vector<16x1xf32> to vector<16x16xf32>
    %28 = arith.subf %24, %27 : vector<16x16xf32>
    %29 = math.exp %28 : vector<16x16xf32>
    %cst_19 = arith.constant 0.000000e+00 : f32
    %30 = vector.broadcast %cst_19 : f32 to vector<16x16xf32>
    %31 = arith.select %3, %29, %30 : vector<16x16xi1>, vector<16x16xf32>
    %cst_20 = arith.constant dense<0.000000e+00> : vector<16xf32>
    %32 = vector.multi_reduction <add>, %31, %cst_20 [1] : vector<16x16xf32> to vector<16xf32>
    %33 = vector.shape_cast %32 : vector<16xf32> to vector<16x1xf32>
    %cst_21 = arith.constant 1.000000e-30 : f32
    %34 = vector.broadcast %cst_21 : f32 to vector<16x1xf32>
    %35 = arith.maximumf %33, %34 : vector<16x1xf32>
    %36 = tpu.reciprocal %35 {approx = true} : vector<16x1xf32> -> vector<16x1xf32>
    %37 = vector.broadcast %36 : vector<16x1xf32> to vector<16x16xf32>
    %38 = arith.mulf %31, %37 : vector<16x16xf32>
    %cst_22 = arith.constant dense<0.000000e+00> : vector<16x8xf32>
    %39 = tpu.matmul %38, %12, %cst_22 {dimension_numbers = #tpu.dot_dimension_numbers<[1], [0], [0], [1], [0, 0, 1, 1], [], []>} : vector<16x16xf32>, vector<16x8xf32>, vector<16x8xf32> -> vector<16x8xf32>
    %cst_23 = arith.constant 0.000000e+00 : f32
    %40 = vector.broadcast %cst_23 : f32 to vector<16x8xf32>
    %41 = arith.cmpf ogt, %39, %40 : vector<16x8xf32>
    %42 = math.exp %39 : vector<16x8xf32>
    %cst_24 = arith.constant 1.000000e+00 : f32
    %43 = vector.broadcast %cst_24 : f32 to vector<16x8xf32>
    %44 = arith.subf %42, %43 : vector<16x8xf32>
    %45 = arith.select %41, %39, %44 : vector<16x8xi1>, vector<16x8xf32>
    %46 = vector.extract_strided_slice %10 {offsets = [0, 0], sizes = [8, 4], strides = [1, 1]} : vector<16x4xf32> to vector<8x4xf32>
    %cst_25 = arith.constant dense<0.000000e+00> : vector<16x4xf32>
    %47 = tpu.matmul %45, %46, %cst_25 {dimension_numbers = #tpu.dot_dimension_numbers<[1], [0], [0], [1], [0, 0, 1, 1], [], []>} : vector<16x8xf32>, vector<8x4xf32>, vector<16x4xf32> -> vector<16x4xf32>
    %48 = arith.addf %11, %47 : vector<16x4xf32>
    %49 = vector.extract_strided_slice %5 {offsets = [0, 8], sizes = [16, 8], strides = [1, 1]} : vector<16x16xf32> to vector<16x8xf32>
    %50 = vector.extract_strided_slice %7 {offsets = [1, 0], sizes = [1, 16], strides = [1, 1]} : vector<2x16xf32> to vector<1x16xf32>
    %51 = vector.extract_strided_slice %9 {offsets = [0, 1], sizes = [16, 1], strides = [1, 1]} : vector<16x2xf32> to vector<16x1xf32>
    %52 = vector.broadcast %50 : vector<1x16xf32> to vector<16x16xf32>
    %53 = vector.broadcast %51 : vector<16x1xf32> to vector<16x16xf32>
    %54 = arith.addf %52, %53 : vector<16x16xf32>
    %cst_26 = arith.constant 0.000000e+00 : f32
    %55 = vector.broadcast %cst_26 : f32 to vector<16x16xf32>
    %56 = arith.cmpf ogt, %54, %55 : vector<16x16xf32>
    %cst_27 = arith.constant 0.00999999977 : f32
    %57 = vector.broadcast %cst_27 : f32 to vector<16x16xf32>
    %58 = arith.mulf %57, %54 : vector<16x16xf32>
    %59 = arith.select %56, %54, %58 : vector<16x16xi1>, vector<16x16xf32>
    %cst_28 = arith.constant -1.000000e+30 : f32
    %60 = vector.broadcast %cst_28 : f32 to vector<16x16xf32>
    %61 = arith.select %3, %59, %60 : vector<16x16xi1>, vector<16x16xf32>
    %cst_29 = arith.constant dense<0xFF800000> : vector<16xf32>
    %62 = vector.multi_reduction <maximumf>, %61, %cst_29 [1] : vector<16x16xf32> to vector<16xf32>
    %63 = vector.shape_cast %62 : vector<16xf32> to vector<16x1xf32>
    %64 = vector.broadcast %63 : vector<16x1xf32> to vector<16x16xf32>
    %65 = arith.subf %61, %64 : vector<16x16xf32>
    %66 = math.exp %65 : vector<16x16xf32>
    %cst_30 = arith.constant 0.000000e+00 : f32
    %67 = vector.broadcast %cst_30 : f32 to vector<16x16xf32>
    %68 = arith.select %3, %66, %67 : vector<16x16xi1>, vector<16x16xf32>
    %cst_31 = arith.constant dense<0.000000e+00> : vector<16xf32>
    %69 = vector.multi_reduction <add>, %68, %cst_31 [1] : vector<16x16xf32> to vector<16xf32>
    %70 = vector.shape_cast %69 : vector<16xf32> to vector<16x1xf32>
    %cst_32 = arith.constant 1.000000e-30 : f32
    %71 = vector.broadcast %cst_32 : f32 to vector<16x1xf32>
    %72 = arith.maximumf %70, %71 : vector<16x1xf32>
    %73 = tpu.reciprocal %72 {approx = true} : vector<16x1xf32> -> vector<16x1xf32>
    %74 = vector.broadcast %73 : vector<16x1xf32> to vector<16x16xf32>
    %75 = arith.mulf %68, %74 : vector<16x16xf32>
    %cst_33 = arith.constant dense<0.000000e+00> : vector<16x8xf32>
    %76 = tpu.matmul %75, %49, %cst_33 {dimension_numbers = #tpu.dot_dimension_numbers<[1], [0], [0], [1], [0, 0, 1, 1], [], []>} : vector<16x16xf32>, vector<16x8xf32>, vector<16x8xf32> -> vector<16x8xf32>
    %cst_34 = arith.constant 0.000000e+00 : f32
    %77 = vector.broadcast %cst_34 : f32 to vector<16x8xf32>
    %78 = arith.cmpf ogt, %76, %77 : vector<16x8xf32>
    %79 = math.exp %76 : vector<16x8xf32>
    %cst_35 = arith.constant 1.000000e+00 : f32
    %80 = vector.broadcast %cst_35 : f32 to vector<16x8xf32>
    %81 = arith.subf %79, %80 : vector<16x8xf32>
    %82 = arith.select %78, %76, %81 : vector<16x8xi1>, vector<16x8xf32>
    %83 = vector.extract_strided_slice %10 {offsets = [8, 0], sizes = [8, 4], strides = [1, 1]} : vector<16x4xf32> to vector<8x4xf32>
    %cst_36 = arith.constant dense<0.000000e+00> : vector<16x4xf32>
    %84 = tpu.matmul %82, %83, %cst_36 {dimension_numbers = #tpu.dot_dimension_numbers<[1], [0], [0], [1], [0, 0, 1, 1], [], []>} : vector<16x8xf32>, vector<8x4xf32>, vector<16x4xf32> -> vector<16x4xf32>
    %85 = arith.addf %48, %84 : vector<16x4xf32>
    %c0_37 = arith.constant 0 : index
    %c0_38 = arith.constant 0 : index
    %86 = vector.load %arg6[%c0_37, %c0_38] : memref<1x4xf32, #tpu.memory_space<vmem>>, vector<1x4xf32>
    %cst_39 = arith.constant dense<0.000000e+00> : vector<1x16xf32>
    %87 = tpu.matmul %86, %85, %cst_39 {dimension_numbers = #tpu.dot_dimension_numbers<[1], [1], [0], [0], [0, 0, 1, 0], [], []>} : vector<1x4xf32>, vector<16x4xf32>, vector<1x16xf32> -> vector<1x16xf32>
    %c0_40 = arith.constant 0 : index
    %c0_41 = arith.constant 0 : index
    %88 = vector.load %arg7[%c0_40, %c0_41] : memref<4x1xf32, #tpu.memory_space<vmem>>, vector<4x1xf32>
    %cst_42 = arith.constant dense<0.000000e+00> : vector<16x1xf32>
    %89 = tpu.matmul %85, %88, %cst_42 {dimension_numbers = #tpu.dot_dimension_numbers<[1], [0], [0], [1], [0, 0, 1, 1], [], []>} : vector<16x4xf32>, vector<4x1xf32>, vector<16x1xf32> -> vector<16x1xf32>
    %90 = vector.broadcast %87 : vector<1x16xf32> to vector<16x16xf32>
    %91 = vector.broadcast %89 : vector<16x1xf32> to vector<16x16xf32>
    %92 = arith.addf %90, %91 : vector<16x16xf32>
    %cst_43 = arith.constant 0.000000e+00 : f32
    %93 = vector.broadcast %cst_43 : f32 to vector<16x16xf32>
    %94 = arith.cmpf ogt, %92, %93 : vector<16x16xf32>
    %cst_44 = arith.constant 0.00999999977 : f32
    %95 = vector.broadcast %cst_44 : f32 to vector<16x16xf32>
    %96 = arith.mulf %95, %92 : vector<16x16xf32>
    %97 = arith.select %94, %92, %96 : vector<16x16xi1>, vector<16x16xf32>
    %cst_45 = arith.constant -1.000000e+30 : f32
    %98 = vector.broadcast %cst_45 : f32 to vector<16x16xf32>
    %99 = arith.select %3, %97, %98 : vector<16x16xi1>, vector<16x16xf32>
    %cst_46 = arith.constant dense<0xFF800000> : vector<16xf32>
    %100 = vector.multi_reduction <maximumf>, %99, %cst_46 [1] : vector<16x16xf32> to vector<16xf32>
    %101 = vector.shape_cast %100 : vector<16xf32> to vector<16x1xf32>
    %102 = vector.broadcast %101 : vector<16x1xf32> to vector<16x16xf32>
    %103 = arith.subf %99, %102 : vector<16x16xf32>
    %104 = math.exp %103 : vector<16x16xf32>
    %cst_47 = arith.constant 0.000000e+00 : f32
    %105 = vector.broadcast %cst_47 : f32 to vector<16x16xf32>
    %106 = arith.select %3, %104, %105 : vector<16x16xi1>, vector<16x16xf32>
    %cst_48 = arith.constant dense<0.000000e+00> : vector<16xf32>
    %107 = vector.multi_reduction <add>, %106, %cst_48 [1] : vector<16x16xf32> to vector<16xf32>
    %108 = vector.shape_cast %107 : vector<16xf32> to vector<16x1xf32>
    %cst_49 = arith.constant 1.000000e-30 : f32
    %109 = vector.broadcast %cst_49 : f32 to vector<16x1xf32>
    %110 = arith.maximumf %108, %109 : vector<16x1xf32>
    %111 = tpu.reciprocal %110 {approx = true} : vector<16x1xf32> -> vector<16x1xf32>
    %112 = vector.broadcast %111 : vector<16x1xf32> to vector<16x16xf32>
    %113 = arith.mulf %106, %112 : vector<16x16xf32>
    %cst_50 = arith.constant dense<0.000000e+00> : vector<16x4xf32>
    %114 = tpu.matmul %113, %85, %cst_50 {dimension_numbers = #tpu.dot_dimension_numbers<[1], [0], [0], [1], [0, 0, 1, 1], [], []>} : vector<16x16xf32>, vector<16x4xf32>, vector<16x4xf32> -> vector<16x4xf32>
    %c0_51 = arith.constant 0 : index
    %c0_52 = arith.constant 0 : index
    %115 = vector.load %arg8[%c0_51, %c0_52] : memref<16x4xf32, #tpu.memory_space<vmem>>, vector<16x4xf32>
    tpu.vector_store %arg8[%c0_51, %c0_52], %114 {strides = array<i32>} : memref<16x4xf32, #tpu.memory_space<vmem>>, vector<16x4xf32>,
    return
  }
}

</mosaic_0001>

<bundles_post_ra>
// kernel: gat_forward.1
= control target key start
LH: loop header
LB: loop body
LE: loop exit
PB: predicated region body
PF: predicated region fallthrough
CT: control target
= control target key end

     0   :  { %vm36_vm0 = vcmask 64512   ;;  %v1219_v6 = vmov 0.0|0.0   ;;  %vm1220_vm1 = vmmov 0   ;;  %v1221_v7 = vmov 0.0   ;;  %s1405_s2 = inlined_call_operand.vmem [shape: f32[8,16], index: 2, kind: input, shape index: {}]   ;;  %s1406_s0 = inlined_call_operand.vmem [shape: f32[16,8], index: 0, kind: input, shape index: {}]   ;;  %s1407_s4 = inlined_call_operand.vmem [shape: f32[16,2], index: 4, kind: input, shape index: {}]   ;;  %s1408_s3 = inlined_call_operand.vmem [shape: f32[2,16], index: 3, kind: input, shape index: {}]   ;;  %s1409_s1 = inlined_call_operand.vmem [shape: f32[16,16], index: 1, kind: input, shape index: {}]   ;;  %s1410_s5 = inlined_call_operand.vmem [shape: f32[16,4], index: 5, kind: input, shape index: {}]   ;;  %s1411_s7 = inlined_call_operand.vmem [shape: f32[4,1], index: 7, kind: input, shape index: {}]   ;;  %s1412_s6 = inlined_call_operand.vmem [shape: f32[1,4], index: 6, kind: input, shape index: {}]   ;;  %s1413_s8 = inlined_call_operand.vmem [shape: f32[16,4], index: 8, kind: output, shape index: {}]  }
   0x1   :  { %v35_v0 = vld [vmem:[%s1405_s2] sm:$0xff]  ;;  %v30_v2 = vld [vmem:[%s1406_s0 + $0x8] sm:$0xff]  ;;  %1147 = vmatprep.subr.bf16.mxu1 %v1219_v6  ;;  %1094 = vmatprep.mubr.msk.f32.mxu1 %vm1220_vm1, %v1221_v7  ;;  %vm119_vm2 = vcmask 130048   ;;  %v1222_v13 = vmov 1   ;;  %v1223_v14 = vmov 0   ;;  %v278_v19 = vlaneseq }
   0x2   :  { %v29_v1 = vld [vmem:[%s1406_s0] sm:$0xff]  ;;  %1085 = vmatprep.subr.mxu0 %v35_v0  ;;  %v200_v4 = vld [vmem:[%s1407_s4 + $0x8] sm:$0xff]  ;;  %vm1149_vm3 = vmpackc.low %vm119_vm2, %vm119_vm2  ;;  %1179 = vset.pattern.permute.xlu0 %v1222_v13  ;;  %vm808_vm12 = vcmask 1043456   ;;  %vm727_vm15 = vcmask 31744  }
   0x3   :  { %1087 = vmatprep.mubr.msk.f32.mxu0 %vm36_vm0, %v29_v1  ;;  %v199_v3 = vld [vmem:[%s1407_s4] sm:$0xff]  ;;  %1086 = vmatpush3.msra.mxu0 %v35_v0  ;;  %v1308_v20 = vshrl.u32 %v278_v19, 7  ;;  %v1323_v30 = vld [vmem:[%s1409_s1 + $0x8] sm:$0xff] }
   0x4   :  { %v1151_v5 = vpack.c.bf16 %v200_v4, %v199_v3  ;;  %1088 = vmatmul.mubr.msk.f32.vlgmr.msra.gmra.mrb[0].mxu0 %vm36_vm0, %v30_v2  ;;  %v118_v12 = vld [vmem:[%s1408_s3] sm:$0x3]  ;;  %1180 = vset.pattern.permute.xlu1 %v1223_v14  ;;  %vm34_vm7 = vcmp.gt.f32.partialorder %v1323_v30, 0.0 }
   0x5   :  { %v280_v21 = vsub.s32 0, %v1308_v20  ;;  %v421_v22 = vsub.s32 1, %v1308_v20  ;;  %v1317_v25 = vld [vmem:[%s1409_s1] sm:$0xff]  ;;  %s1224_s1 = smov 120  }
   0x6   :  { %1152 = vmatprep.subr.bf16.mxu0 %v1151_v5  ;;  %vm33_vm4 = vcmp.gt.f32.partialorder %v1317_v25, 0.0 }
   0x7   :  { %1154 = vmatpush3.bf16.msra.mxu0 %v1151_v5 }
  0xd7   :  { %v1290_v8 = vpop.f32.mrb[0].mxu0 }
  0xd8   :  { %v1292_v9 = vpop.f32.mrb[1].mxu0 }
  0xd9   :  { %v1181_v10 = vpack.i.bf16 %v1290_v8, %v1292_v9  ;;  %v1148_v11 = vpack.c.bf16 %v1290_v8, %v1292_v9  ;;  %1101 = vmatprep.mubr.msk.f32.mxu0 %vm119_vm2, %v1292_v9 }
  0xda   :  { %1102 = vmatmul.mubr.msk.f32.vlgmr.msra.gmra.mrb[2].mxu0 %vm119_vm2, %v1290_v8 }
  0xdb   :  { %1150 = vmatpush3.bf16.xpose.msk.msra.mxu1 %vm1149_vm3, %v1148_v11  ;;  %1156 = vmatprep.subr.bf16.mxu0 %v1148_v11 }
  0xdc   :  { %1158 = vmatpush3.bf16.msra.mxu0 %v1148_v11 }
  0xe2   :  { %1095 = vmatmul.mubr.msk.f32.vlgmr.msra.gmra.mrb[0].mxu1 %vm119_vm2, %v118_v12 }
 0x1ad   :  { %v1103_v15 = vpop.f32.mrb[2].mxu0 }
 0x1ae   :  { %v267_v16 = vpop.f32.mrb[3].mxu0 }
 0x1af   :  { %284 = vperm.xlu1 %1180, %v267_v16   ;;  %424 = vperm.xlu0 %1179, %v267_v16  }
 0x1b3   :  { %289 = vperm.xlu1 %1180, %v1103_v15   ;;  %428 = vperm.xlu0 %1179, %v1103_v15  }
 0x1b5   :  { %v195_v17 = vpop.f32.mrb[0].mxu1 }
 0x1b6   :  { %v1096_v18 = vpop.f32.mrb[1].mxu1  ;;  %v281_v23 = vrot.slane %v195_v17, %v280_v21  ;;  %v422_v24 = vrot.slane %v195_v17, %v421_v22 }
 0x1b7   :  { %1186 = vset.pattern.permute.xlu0 %v1223_v14 }
 0x22e   :  { %v285_v26 = vpop.permute.xlu1 %284  ;;  %v425_v27 = vpop.permute.xlu0 %424 }
 0x22f   :  { %v292_v28 = vadd.f32 %v285_v26, %v281_v23  ;;  %v431_v29 = vadd.f32 %v425_v27, %v422_v24 }
 0x231   :  { %v296_v31 = vmul.f32 0.01, %v292_v28  ;;  %v435_v32 = vmul.f32 0.01, %v431_v29  ;;  %vm433_vm5 = vcmp.gt.f32.partialorder %v431_v29, 0.0  ;;  %vm294_vm6 = vcmp.gt.f32.partialorder %v292_v28, 0.0 }
 0x232   :  { %v290_v33 = vpop.permute.xlu1 %289  ;;  %v429_v34 = vpop.permute.xlu0 %428 }
 0x233   :  { %v293_v35 = vadd.f32 %v290_v33, %v281_v23  ;;  %v432_v36 = vadd.f32 %v429_v34, %v422_v24  ;;  %v437_v37 = vsel %vm433_vm5, %v431_v29, %v435_v32  ;;  %v298_v38 = vsel %vm294_vm6, %v292_v28, %v296_v31 }
 0x234   :  { %v439_v39 = vsel %vm33_vm4, %v437_v37, -1e+30  ;;  %v300_v43 = vsel %vm33_vm4, %v298_v38, -1e+30  ;;  %v277_v37 = vld [vmem:[%s1410_s5 + $0x8] sm:$0xff] }
 0x235   :  { %v297_v40 = vmul.f32 0.01, %v293_v35  ;;  %v436_v41 = vmul.f32 0.01, %v432_v36  ;;  %v441_v42 = vsel %vm119_vm2, %v439_v39, -inf  ;;  %vm434_vm8 = vcmp.gt.f32.partialorder %v432_v36, 0.0  ;;  %1118 = vmatprep.subr.mxu0 %v277_v37 }
 0x236   :  { %442 = vmax.xlane.f32.xlu0 %v441_v42  ;;  %vm295_vm9 = vcmp.gt.f32.partialorder %v293_v35, 0.0  ;;  %v302_v48 = vsel %vm119_vm2, %v300_v43, -inf }
 0x237   :  { %v438_v44 = vsel %vm434_vm8, %v432_v36, %v436_v41  ;;  %v299_v45 = vsel %vm295_vm9, %v293_v35, %v297_v40 }
 0x238   :  { %v440_v46 = vsel %vm34_vm7, %v438_v44, -1e+30  ;;  %v301_v49 = vsel %vm34_vm7, %v299_v45, -1e+30 }
 0x239   :  { %v444_v47 = vsel %vm119_vm2, %v440_v46, -inf  ;;  %v305_v50 = vsel %vm119_vm2, %v301_v49, -inf }
 0x23a   :  { %445 = vmax.xlane.f32.xlu1 %v444_v47  ;;  %303 = vmax.xlane.f32.xlu0 %v302_v48 }
 0x23e   :  { %306 = vmax.xlane.f32.xlu0 %v305_v50 }
 0x2c3   :  { %v443_v51 = vpop.xlane.xlu0 %442 }
 0x2c4   :  { %v447_v52 = vsub.f32 %v439_v39, %v443_v51 }
 0x2c6   :  { %v449_v53 = vmul.f32 1.442695, %v447_v52  ;;  %v807_v52 = vld [vmem:[%s1411_s7] sm:$0xf] }
 0x2c7   :  { %v446_v54 = vpop.xlane.xlu1 %445  ;;  %v304_v55 = vpop.xlane.xlu0 %303 }
 0x2c8   :  { %1187 = vpow2.f32 %v449_v53  ;;  %v448_v56 = vsub.f32 %v440_v46, %v446_v54  ;;  %v308_v57 = vsub.f32 %v300_v43, %v304_v55 }
 0x2ca   :  { %v451_v58 = vmul.f32 1.442695, %v448_v56  ;;  %v310_v59 = vmul.f32 1.442695, %v308_v57 }
 0x2cb   :  { %v307_v60 = vpop.xlane.xlu0 %306 }
 0x2cc   :  { %1189 = vpow2.f32 %v451_v58  ;;  %v309_v61 = vsub.f32 %v301_v49, %v307_v60 }
 0x2cd   :  { %1191 = vpow2.f32 %v310_v59 }
 0x2ce   :  { %v312_v62 = vmul.f32 1.442695, %v309_v61  ;;  %v726_v61 = vld [vmem:[%s1412_s6] sm:$0x1] }
 0x2d0   :  { %1193 = vpow2.f32 %v312_v62 }
 0x2d2   :  { %v1188_v63 = vpop.eup %1187 }
 0x2d3   :  { %v453_v0 = vsel %vm33_vm4, %v1188_v63, 0.0 }
 0x2d4   :  { %v455_v1 = vsel %vm119_vm2, %v453_v0, 0.0 }
 0x2d5   :  { %456 = vadd.xlane.f32.xlu1 %v455_v1 }
 0x2d6   :  { %v1190_v2 = vpop.eup %1189 }
 0x2d7   :  { %v1192_v3 = vpop.eup %1191  ;;  %v454_v4 = vsel %vm34_vm7, %v1190_v2, 0.0 }
 0x2d8   :  { %v458_v5 = vsel %vm119_vm2, %v454_v4, 0.0  ;;  %v314_v11 = vsel %vm33_vm4, %v1192_v3, 0.0 }
 0x2d9   :  { %459 = vadd.xlane.f32.xlu0 %v458_v5  ;;  %v316_v12 = vsel %vm119_vm2, %v314_v11, 0.0 }
 0x2da   :  { %v1194_v13 = vpop.eup %1193  ;;  %317 = vadd.xlane.f32.xlu1 %v316_v12 }
 0x2db   :  { %v315_v14 = vsel %vm34_vm7, %v1194_v13, 0.0 }
 0x2dc   :  { %v319_v15 = vsel %vm119_vm2, %v315_v14, 0.0 }
 0x2dd   :  { %320 = vadd.xlane.f32.xlu0 %v319_v15 }
 0x2eb   :  { %1182 = vrot.lane.b32.xlu1 %v1181_v10, %s1224_s1 }
 0x362   :  { %v457_v16 = vpop.xlane.xlu1 %456 }
 0x363   :  { %v461_v17 = vmax.f32 %v457_v16, 1e-30 }
 0x365   :  { %1195 = vrcp.f32 %v461_v17 }
 0x366   :  { %v460_v18 = vpop.xlane.xlu0 %459 }
 0x367   :  { %v318_v19 = vpop.xlane.xlu1 %317  ;;  %v462_v22 = vmax.f32 %v460_v18, 1e-30 }
 0x368   :  { %v322_v23 = vmax.f32 %v318_v19, 1e-30 }
 0x369   :  { %1197 = vrcp.f32 %v462_v22 }
 0x36a   :  { %1199 = vrcp.f32 %v322_v23  ;;  %v321_v24 = vpop.xlane.xlu0 %320 }
 0x36b   :  { %v1183_v26 = vpop.permute.xlu1 %1182  ;;  %v323_v27 = vmax.f32 %v321_v24, 1e-30 }
 0x36c   :  { %v1185_v28 = vunpack.i.h.bf16 %v1183_v26  ;;  %v1184_v29 = vunpack.i.l.bf16 %v1183_v26 }
 0x36d   :  { %1201 = vrcp.f32 %v323_v27 }
 0x36e   :  { %v1159_v31 = vpack.c.bf16 %v1185_v28, %v1184_v29 }
 0x36f   :  { %v1196_v32 = vpop.eup %1195 }
 0x370   :  { %1160 = vmatprep.subr.bf16.mxu1 %v1159_v31  ;;  %v465_v8 = vmul.f32 %v1196_v32, %v453_v0 }
 0x371   :  { %1162 = vmatpush3.bf16.msra.mxu1 %v1159_v31 }
 0x372   :  { %1115 = vmatprep.mubr.msk.f32.mxu1 %vm119_vm2, %v465_v8  ;;  %1163 = vmatprep.subr.bf16.mxu1 %v1219_v6  ;;  %v276_v6 = vld [vmem:[%s1410_s5] sm:$0xff] }
 0x373   :  { %v1198_v9 = vpop.eup %1197 }
 0x374   :  { %v1200_v10 = vpop.eup %1199  ;;  %v466_v33 = vmul.f32 %v1198_v9, %v454_v4 }
 0x375   :  { %v326_v34 = vmul.f32 %v1200_v10, %v314_v11 }
 0x376   :  { %1116 = vmatmul.mubr.msk.f32.vlgmr.msra.gmra.mrb[2].mxu1 %vm119_vm2, %v466_v33 }
 0x377   :  { %v1202_v35 = vpop.eup %1201  ;;  %1108 = vmatprep.mubr.msk.f32.mxu0 %vm119_vm2, %v326_v34  ;;  %1132 = vmatprep.mubr.msk.f32.mxu1 %vm1220_vm1, %v1221_v7  ;;  %vm1165_vm1 = vmpackc.low %vm727_vm15, %vm727_vm15 }
 0x378   :  { %v327_v36 = vmul.f32 %v1202_v35, %v315_v14 }
 0x37a   :  { %1109 = vmatmul.mubr.msk.f32.vlgmr.msra.gmra.mrb[4].mxu0 %vm119_vm2, %v327_v36 }
 0x37b   :  { %1119 = vmatpush3.msra.mxu0 %v277_v37 }
 0x37c   :  { %1123 = vmatprep.subr.mxu0 %v276_v6 }
 0x449   :  { %v1117_v38 = vpop.f32.mrb[2].mxu1 }
 0x44a   :  { %v558_v39 = vmul.f32 1.442695, %v1117_v38  ;;  %v545_v40 = vpop.f32.mrb[3].mxu1  ;;  %vm555_vm11 = vcmp.gt.f32.partialorder %v1117_v38, 0.0 }
 0x44b   :  { %v556_v41 = vmul.f32 1.442695, %v545_v40  ;;  %vm554_vm10 = vcmp.gt.f32.partialorder %v545_v40, 0.0 }
 0x44c   :  { %1203 = vpow2.f32 %v558_v39 }
 0x44d   :  { %1205 = vpow2.f32 %v556_v41  ;;  %v1110_v7 = vpop.f32.mrb[4].mxu0 }
 0x44e   :  { %v413_v42 = vmul.f32 1.442695, %v1110_v7  ;;  %v400_v43 = vpop.f32.mrb[5].mxu0  ;;  %vm410_vm14 = vcmp.gt.f32.partialorder %v1110_v7, 0.0 }
 0x44f   :  { %v411_v44 = vmul.f32 1.442695, %v400_v43  ;;  %vm409_vm13 = vcmp.gt.f32.partialorder %v400_v43, 0.0 }
 0x451   :  { %1207 = vpow2.f32 %v411_v44 }
 0x452   :  { %1209 = vpow2.f32 %v413_v42 }
 0x456   :  { %v1204_v45 = vpop.eup %1203 }
 0x457   :  { %v1206_v46 = vpop.eup %1205  ;;  %v1038_v47 = vadd.f32 -1.0, %v1204_v45 }
 0x458   :  { %v1037_v48 = vadd.f32 -1.0, %v1206_v46 }
 0x459   :  { %v563_v51 = vsel %vm555_vm11, %v1117_v38, %v1038_v47 }
 0x45a   :  { %v562_v49 = vsel %vm554_vm10, %v545_v40, %v1037_v48 }
 0x45b   :  { %v1208_v50 = vpop.eup %1207  ;;  %1120 = vmatprep.mubr.msk.f32.mxu0 %vm36_vm0, %v562_v49 }
 0x45c   :  { %v1210_v53 = vpop.eup %1209  ;;  %v1033_v54 = vadd.f32 -1.0, %v1208_v50  ;;  %1121 = vmatmul.mubr.msk.f32.vlgmr.msra.gmra.mrb[6].mxu0 %vm36_vm0, %v563_v51 }
 0x45d   :  { %1124 = vmatpush3.msra.mxu0 %v276_v6  ;;  %v1034_v56 = vadd.f32 -1.0, %v1210_v53 }
 0x45e   :  { %v417_v55 = vsel %vm409_vm13, %v400_v43, %v1033_v54  ;;  %1135 = vmatprep.subr.msk.mxu0 %vm808_vm12, %v807_v52 }
 0x45f   :  { %1125 = vmatprep.mubr.msk.f32.mxu0 %vm36_vm0, %v417_v55  ;;  %v418_v57 = vsel %vm410_vm14, %v1110_v7, %v1034_v56 }
 0x464   :  { %1126 = vmatmul.mubr.msk.f32.vlgmr.msra.gmra.mrb[6].mxu0 %vm36_vm0, %v418_v57 }
 0x465   :  { %1136 = vmatpush3.msk.msra.mxu0 %vm808_vm12, %v807_v52 }
 0x537   :  { %v1127_v58 = vpop.f32.mrb[6].mxu0 }
 0x538   :  { %v717_v59 = vpop.f32.mrb[7].mxu0 }
 0x539   :  { %v1164_v60 = vpack.c.bf16 %v1127_v58, %v717_v59  ;;  %1137 = vmatprep.mubr.msk.f32.mxu0 %vm727_vm15, %v717_v59 }
 0x53a   :  { %1138 = vmatmul.mubr.msk.f32.vlgmr.msra.gmra.mrb[8].mxu0 %vm727_vm15, %v1127_v58 }
 0x53b   :  { %1166 = vmatpush3.bf16.xpose.msk.msra.mxu1 %vm1165_vm1, %v1164_v60 }
 0x53c   :  { %1168 = vmatprep.subr.bf16.mxu1 %v1164_v60 }
 0x542   :  { %1133 = vmatmul.mubr.msk.f32.vlgmr.msra.gmra.mrb[4].mxu1 %vm727_vm15, %v726_v61 }
 0x543   :  { %1170 = vmatpush3.bf16.msra.mxu1 %v1164_v60 }
 0x60d   :  { %v1139_v62 = vpop.f32.mrb[8].mxu0 }
 0x60e   :  { %898 = vperm.xlu1 %1180, %v1139_v62   ;;  %v878_v63 = vpop.f32.mrb[9].mxu0 }
 0x60f   :  { %893 = vperm.xlu0 %1186, %v878_v63  }
 0x615   :  { %v803_v0 = vpop.f32.mrb[4].mxu1 }
 0x616   :  { %v1134_v1 = vpop.f32.mrb[5].mxu1  ;;  %v890_v2 = vrot.slane %v803_v0, %v280_v21 }
 0x68d   :  { %v899_v3 = vpop.permute.xlu1 %898 }
 0x68e   :  { %v902_v4 = vadd.f32 %v899_v3, %v890_v2  ;;  %v894_v5 = vpop.permute.xlu0 %893 }
 0x68f   :  { %v901_v11 = vadd.f32 %v894_v5, %v890_v2 }
 0x690   :  { %v906_v12 = vmul.f32 0.01, %v902_v4  ;;  %vm904_vm0 = vcmp.gt.f32.partialorder %v902_v4, 0.0 }
 0x691   :  { %v905_v13 = vmul.f32 0.01, %v901_v11  ;;  %vm903_vm3 = vcmp.gt.f32.partialorder %v901_v11, 0.0 }
 0x692   :  { %v908_v14 = vsel %vm904_vm0, %v902_v4, %v906_v12 }
 0x693   :  { %v910_v15 = vsel %vm34_vm7, %v908_v14, -1e+30  ;;  %v907_v16 = vsel %vm903_vm3, %v901_v11, %v905_v13 }
 0x694   :  { %v914_v17 = vsel %vm119_vm2, %v910_v15, -inf  ;;  %v909_v18 = vsel %vm33_vm4, %v907_v16, -1e+30 }
 0x695   :  { %915 = vmax.xlane.f32.xlu0 %v914_v17  ;;  %v911_v20 = vsel %vm119_vm2, %v909_v18, -inf }
 0x696   :  { %912 = vmax.xlane.f32.xlu1 %v911_v20 }
 0x722   :  { %v916_v21 = vpop.xlane.xlu0 %915 }
 0x723   :  { %v918_v19 = vsub.f32 %v910_v15, %v916_v21  ;;  %v913_v22 = vpop.xlane.xlu1 %912 }
 0x724   :  { %v917_v23 = vsub.f32 %v909_v18, %v913_v22 }
 0x725   :  { %v921_v24 = vmul.f32 1.442695, %v918_v19 }
 0x726   :  { %v919_v26 = vmul.f32 1.442695, %v917_v23 }
 0x727   :  { %1211 = vpow2.f32 %v921_v24 }
 0x728   :  { %1213 = vpow2.f32 %v919_v26 }
 0x731   :  { %v1212_v27 = vpop.eup %1211 }
 0x732   :  { %v1214_v28 = vpop.eup %1213  ;;  %v924_v32 = vsel %vm34_vm7, %v1212_v27, 0.0 }
 0x733   :  { %v923_v29 = vsel %vm33_vm4, %v1214_v28, 0.0  ;;  %v928_v8 = vsel %vm119_vm2, %v924_v32, 0.0 }
 0x734   :  { %v925_v31 = vsel %vm119_vm2, %v923_v29, 0.0 }
 0x735   :  { %926 = vadd.xlane.f32.xlu1 %v925_v31 }
 0x739   :  { %929 = vadd.xlane.f32.xlu1 %v928_v8 }
 0x7c2   :  { %v927_v9 = vpop.xlane.xlu1 %926 }
 0x7c3   :  { %v931_v10 = vmax.f32 %v927_v9, 1e-30 }
 0x7c5   :  { %1215 = vrcp.f32 %v931_v10 }
 0x7c6   :  { %v930_v33 = vpop.xlane.xlu1 %929 }
 0x7c7   :  { %v932_v34 = vmax.f32 %v930_v33, 1e-30 }
 0x7c9   :  { %1217 = vrcp.f32 %v932_v34 }
 0x7cf   :  { %v1216_v35 = vpop.eup %1215 }
 0x7d0   :  { %v935_v36 = vmul.f32 %v1216_v35, %v923_v29 }
 0x7d2   :  { %1144 = vmatprep.mubr.msk.f32.mxu1 %vm119_vm2, %v935_v36 }
 0x7d3   :  { %v1218_v25 = vpop.eup %1217 }
 0x7d4   :  { %v936_v37 = vmul.f32 %v1218_v25, %v924_v32 }
 0x7d6   :  { %1145 = vmatmul.mubr.msk.f32.vlgmr.msra.gmra.mrb[6].mxu1 %vm119_vm2, %v936_v37 }
 0x8a9   :  { %v1146_v6 = vpop.f32.mrb[6].mxu1 }
 0x8aa   :  { %1019 = vst.msk [vmem:[%s1413_s8 + $0x8] sm:$0xff] %vm727_vm15, %v1146_v6  ;;  %v1009_v30 = vpop.f32.mrb[7].mxu1 }
 0x8ab   :  { %1018 = vst.msk [vmem:[%s1413_s8] sm:$0xff] %vm727_vm15, %v1009_v30 }

</bundles_post_ra>
